<compile_context>
chip_gen: v5e
topology: v5e:2x2
jax: 0.10.0
libtpu: 0.0.40
codegen_flags: <defaults>
</compile_context>

<pallas_src>
import jax
import jax.numpy as jnp
from jax.experimental import pallas as pl
from jax.experimental.pallas import tpu as pltpu


def _round_up(x, m):
    return ((x + m - 1) // m) * m


# --------------------------------------------------------------------------
# Pallas kernel: per-sample cross-entropy with ignore_index = -1
# --------------------------------------------------------------------------
def _ohem_ce_kernel(pred_ref, tgt_ref, loss_ref):
    """Per-sample CE for one (TM, C) tile of logits + (TM, 1) int32 labels."""
    x = pred_ref[...]            # (TM, C) logits, native dtype (f32 or bf16)
    labels = tgt_ref[...]        # (TM, 1) int32, -1 == ignore_index

    c = x.shape[-1]
    # (1, C) iota -- the grid is a sequential loop, keep the regenerated iota tiny.
    col_ids = jax.lax.broadcasted_iota(jnp.int32, (1, c), 1)
    onehot = col_ids == labels                                     # (TM, C) bool

    # Gather the target logit via select + max-reduce in the *input* dtype
    # (exact: it just picks one of the stored values, no rounding).
    tgt_logit = jnp.max(jnp.where(onehot, x, float("-inf")),
                        axis=-1, keepdims=True)                    # (TM, 1)
    # Row max in the input dtype (also exact); f32 only for exp/sum/log.
    m = jnp.max(x, axis=-1, keepdims=True)                         # (TM, 1)

    xf = x.astype(jnp.float32)
    mf = m.astype(jnp.float32)
    lse = mf + jnp.log(jnp.sum(jnp.exp(xf - mf), axis=-1, keepdims=True))

    per_sample = lse - tgt_logit.astype(jnp.float32)               # (TM, 1)

    # ignore_index=-1 rows and padded / out-of-bounds tail rows (whose logits
    # may be garbage or NaN) are zeroed with a select -- never a multiply.
    # TODO(synk): labels >= C (invalid for F.cross_entropy) produce +inf here.
    valid = labels >= 0
    loss_ref[...] = jnp.where(valid, per_sample, 0.0).astype(loss_ref.dtype)


# --------------------------------------------------------------------------
# Tile sizing / VMEM budgeting
# --------------------------------------------------------------------------
_VMEM_FALLBACK = 64 * 1024 * 1024   # conservative (v7x-sized) physical VMEM


def _vmem_limit_bytes():
    """Scoped-VMEM request ~= half of this generation's physical VMEM.

    v5e/v6e: 128 MiB physical -> 64 MiB (well above the 16/32 MiB scoped
    defaults); v7x: 64 MiB per TensorCore -> 32 MiB.
    """
    try:
        phys = int(pltpu.get_tpu_info().vmem_capacity_bytes)
    except Exception:
        phys = _VMEM_FALLBACK
    return max(32 * 1024 * 1024, min(96 * 1024 * 1024, phys // 2))


def _pick_tile(n, c, in_dtype, vmem_limit):
    """Largest batch tile whose full footprint fits comfortably in scoped VMEM."""
    c_pad = _round_up(c, 128)
    itemsize = jnp.dtype(in_dtype).itemsize
    bytes_per_row = (
        2 * c_pad * itemsize      # double-buffered logits block (native dtype)
        + 2 * 128 * 4             # (TM,1) int32 labels, lane-padded to 128, x2 buffers
        + 2 * 128 * 4             # (TM,1) f32 losses,  lane-padded to 128, x2 buffers
        + 4 * c_pad * 4           # live f32 (TM,C) intermediates (cast/exp/onehot/select)
    )
    budget = int(vmem_limit * 0.7)           # headroom for compiler scratch
    tm = budget // bytes_per_row
    tm = min(tm, -(-n // 2))                 # >= 2 tiles so "parallel" feeds both v7x TCs
    return max(8, (tm // 8) * 8)


# --------------------------------------------------------------------------
# Exact sum of the k largest values (replaces top_k / sort in the wrapper)
# --------------------------------------------------------------------------
def _sum_top_k(values, k):
    """Exact sum of the k largest entries of `values` (f32, 1-D), O(N) passes."""
    n = values.shape[0]
    if k >= n:
        return jnp.sum(values)

    bits = jax.lax.bitcast_convert_type(values.astype(jnp.float32), jnp.uint32)
    # Monotone uint32 key: ascending float order -> ascending key order
    # (handles negatives too, though CE losses are >= 0 by construction).
    key = jnp.where(bits < jnp.uint32(0x80000000),
                    bits ^ jnp.uint32(0x80000000),
                    ~bits)

    # Binary search for the k-th largest key: the largest t with count(key >= t) >= k.
    def body(_, lohi):
        lo, hi = lohi
        mid = lo + (hi - lo + jnp.uint32(1)) // jnp.uint32(2)
        ge = jnp.sum((key >= mid).astype(jnp.int32))
        take = ge >= k
        return (jnp.where(take, mid, lo), jnp.where(take, hi, mid - jnp.uint32(1)))

    lo0 = jnp.min(key)
    hi0 = jnp.max(key)
    kth, _ = jax.lax.fori_loop(0, 32, body, (lo0, hi0))

    gt = key > kth
    cnt_gt = jnp.sum(gt.astype(jnp.int32))
    sum_gt = jnp.sum(jnp.where(gt, values, 0.0))
    v_k = jnp.max(jnp.where(key == kth, values, -jnp.inf))
    return sum_gt + (k - cnt_gt).astype(jnp.float32) * v_k


# --------------------------------------------------------------------------
# Wrapper
# --------------------------------------------------------------------------
def ohem_loss(pred, target, rate=0.7, tm=None):
    """pred: (N, C) logits (f32 or bf16); target: (N,) int class ids, -1 = ignore."""
    n, c = pred.shape
    keep_num = max(1, min(n, int(n * rate)))     # clamp >= 1 (avoid div-by-zero)

    vmem_limit = _vmem_limit_bytes()
    if tm is None:
        tm = _pick_tile(n, c, pred.dtype, vmem_limit)
    tm = max(8, (int(tm) // 8) * 8)

    num_tiles = -(-n // tm)
    n_pad = num_tiles * tm

    # Only the cheap 1-D label vector is padded (ignore_index). The logits are
    # NOT padded -- no extra HBM copy; the ragged last tile is masked in-kernel.
    tgt = target.astype(jnp.int32)
    if n_pad != n:
        tgt = jnp.pad(tgt, (0, n_pad - n), constant_values=-1)
    tgt2d = tgt.reshape(n_pad, 1)

    losses = pl.pallas_call(
        _ohem_ce_kernel,
        out_shape=jax.ShapeDtypeStruct((n_pad, 1), jnp.float32),
        grid=(num_tiles,),
        in_specs=[
            pl.BlockSpec((tm, c), lambda i: (i, 0)),   # logits, native dtype
            pl.BlockSpec((tm, 1), lambda i: (i, 0)),   # labels (int32 column)
        ],
        out_specs=pl.BlockSpec((tm, 1), lambda i: (i, 0)),
        compiler_params=pltpu.CompilerParams(
            dimension_semantics=("parallel",),
            vmem_limit_bytes=vmem_limit,
        ),
    )(pred, tgt2d)

    per_sample = losses[:n, 0]                         # drop label-padded rows

    # Hard-example mining: exact sum of the keep_num largest per-sample losses.
    return _sum_top_k(per_sample, keep_num) / jnp.float32(keep_num)


# --------------------------------------------------------------------------
# Pure-JAX reference mirroring the PyTorch OHEMLoss forward
# --------------------------------------------------------------------------
def _ref_ohem(pred, target, rate):
    n, c = pred.shape
    logp = jax.nn.log_softmax(pred.astype(jnp.float32), axis=-1)
    safe_t = jnp.clip(target, 0, c - 1)
    nll = -jnp.take_along_axis(logp, safe_t[:, None], axis=1)[:, 0]
    nll = jnp.where(target >= 0, nll, 0.0)             # ignore_index=-1 -> 0
    keep_num = max(1, min(n, int(n * rate)))
    sorted_desc = -jnp.sort(-nll)
    return jnp.sum(sorted_desc[:keep_num]) / jnp.float32(keep_num)


if __name__ == "__main__":
    key = jax.random.PRNGKey(0)
    k_pred, k_tgt = jax.random.split(key)

    N, C = 40, 32
    rate = 0.7
    pred = jax.random.normal(k_pred, (N, C), dtype=jnp.float32)
    target = jax.random.randint(k_tgt, (N,), 0, C, dtype=jnp.int32)
    target = target.at[3].set(-1)        # exercise ignore_index=-1

    # tm=16 -> 3 tiles, ragged last logits tile (rows 32..39 of a 48-row label
    # pad) and a multi-tile "parallel" batch axis.
    loss = ohem_loss(pred, target, rate=rate, tm=16)
    jax.block_until_ready(loss)
    ref = _ref_ohem(pred, target, rate)
    assert jnp.allclose(loss, ref, atol=1e-5, rtol=1e-5), (loss, ref)

    # bf16 logits pass straight through (no wrapper up-cast); max/compare/select
    # run in bf16 in-kernel, exp/sum/log in f32. Auto tile-size path (tm=None).
    pred_bf16 = pred.astype(jnp.bfloat16)
    loss_bf = ohem_loss(pred_bf16, target, rate=rate)
    jax.block_until_ready(loss_bf)
    ref_bf = _ref_ohem(pred_bf16, target, rate)
    assert jnp.allclose(loss_bf, ref_bf, atol=2e-3, rtol=2e-3), (loss_bf, ref_bf)

    print("KERNEL_OK")
</pallas_src>

<mosaic_0001>
module attributes {stable_mosaic.version = 11 : i64} {
  func.func @_ohem_ce_kernel(%arg0: i32, %arg1: memref<16x32xf32, #tpu.memory_space<vmem>>, %arg2: memref<16x1xi32, #tpu.memory_space<vmem>>, %arg3: memref<16x1xf32, #tpu.memory_space<vmem>>) attributes {dimension_semantics = [#tpu.dimension_semantics<parallel>], iteration_bounds = array<i64: 3>, scalar_prefetch = 0 : i64, scratch_operands = 0 : i64, tpu.core_type = #tpu.core_type<tc>, window_params = [{transform_indices = @transform_0, window_bounds = array<i64: 16, 32>}, {transform_indices = @transform_1, window_bounds = array<i64: 16, 1>}, {transform_indices = @transform_2, window_bounds = array<i64: 16, 1>}]} {
    %c0 = arith.constant 0 : index
    %c0_0 = arith.constant 0 : index
    %0 = vector.load %arg1[%c0, %c0_0] : memref<16x32xf32, #tpu.memory_space<vmem>>, vector<16x32xf32>
    %c0_1 = arith.constant 0 : index
    %c0_2 = arith.constant 0 : index
    %1 = vector.load %arg2[%c0_1, %c0_2] : memref<16x1xi32, #tpu.memory_space<vmem>>, vector<16x1xi32>
    %2 = tpu.iota {dimensions = array<i32: 1>} : vector<1x32xi32>
    %3 = vector.broadcast %2 : vector<1x32xi32> to vector<16x32xi32>
    %4 = vector.broadcast %1 : vector<16x1xi32> to vector<16x32xi32>
    %5 = arith.cmpi eq, %3, %4 : vector<16x32xi32>
    %cst = arith.constant 0xFF800000 : f32
    %6 = vector.broadcast %cst : f32 to vector<16x32xf32>
    %7 = arith.select %5, %0, %6 : vector<16x32xi1>, vector<16x32xf32>
    %cst_3 = arith.constant dense<0xFF800000> : vector<16xf32>
    %8 = vector.multi_reduction <maximumf>, %7, %cst_3 [1] : vector<16x32xf32> to vector<16xf32>
    %9 = vector.shape_cast %8 : vector<16xf32> to vector<16x1xf32>
    %cst_4 = arith.constant dense<0xFF800000> : vector<16xf32>
    %10 = vector.multi_reduction <maximumf>, %0, %cst_4 [1] : vector<16x32xf32> to vector<16xf32>
    %11 = vector.shape_cast %10 : vector<16xf32> to vector<16x1xf32>
    %12 = vector.broadcast %11 : vector<16x1xf32> to vector<16x32xf32>
    %13 = arith.subf %0, %12 : vector<16x32xf32>
    %14 = math.exp %13 : vector<16x32xf32>
    %cst_5 = arith.constant dense<0.000000e+00> : vector<16xf32>
    %15 = vector.multi_reduction <add>, %14, %cst_5 [1] : vector<16x32xf32> to vector<16xf32>
    %16 = vector.shape_cast %15 : vector<16xf32> to vector<16x1xf32>
    %17 = math.log %16 : vector<16x1xf32>
    %18 = arith.addf %11, %17 : vector<16x1xf32>
    %19 = arith.subf %18, %9 : vector<16x1xf32>
    %c0_i32 = arith.constant 0 : i32
    %20 = vector.broadcast %c0_i32 : i32 to vector<16x1xi32>
    %21 = arith.cmpi sge, %1, %20 : vector<16x1xi32>
    %cst_6 = arith.constant 0.000000e+00 : f32
    %22 = vector.broadcast %cst_6 : f32 to vector<16x1xf32>
    %23 = arith.select %21, %19, %22 : vector<16x1xi1>, vector<16x1xf32>
    %c0_7 = arith.constant 0 : index
    %c0_8 = arith.constant 0 : index
    %24 = vector.load %arg3[%c0_7, %c0_8] : memref<16x1xf32, #tpu.memory_space<vmem>>, vector<16x1xf32>
    tpu.vector_store %arg3[%c0_7, %c0_8], %23 {strides = array<i32>} : memref<16x1xf32, #tpu.memory_space<vmem>>, vector<16x1xf32>,
    return
  }
  func.func @transform_0(%arg0: i32) -> (i32, i32) {
    %c0_i32 = arith.constant 0 : i32
    %c0_i32_0 = arith.constant 0 : i32
    return %arg0, %c0_i32 : i32, i32
  }
  func.func @transform_1(%arg0: i32) -> (i32, i32) {
    %c0_i32 = arith.constant 0 : i32
    %c0_i32_0 = arith.constant 0 : i32
    return %arg0, %c0_i32 : i32, i32
  }
  func.func @transform_2(%arg0: i32) -> (i32, i32) {
    %c0_i32 = arith.constant 0 : i32
    %c0_i32_0 = arith.constant 0 : i32
    return %arg0, %c0_i32 : i32, i32
  }
}

</mosaic_0001>

<bundles_post_ra>
// kernel: tpu_custom_call.1
= control target key start
LH: loop header
LB: loop body
LE: loop exit
PB: predicated region body
PF: predicated region fallthrough
CT: control target
= control target key end

     0   :  { %s369_s9 = smov 0   ;;  %s402_s0 = inlined_call_operand.vmem [shape: f32[40,32], index: 0, kind: input, shape index: {}]   ;;  %s403_s1 = inlined_call_operand.vmem [shape: s32[48,1], index: 1, kind: input, shape index: {}]   ;;  %s404_s2 = inlined_call_operand.vmem [shape: f32[48,1], index: 2, kind: output, shape index: {}]  }
   0x1 LB: > { %s313_s10 = sadd.s32 4294967295, %s351_s9   ;;  %p317_p0 = scmp.ge.s32.totalorder %s351_s9, 1  ;;  %s351_s9 = sphi %s369_s9, %s12_s9  }
   0x2   : > { %p132_p1 = scmp.lt.s32.totalorder %s351_s9, 4 }
   0x4   : > { %p133_p2 = pnand %p317_p0, %p132_p1 }
   0x5   : > { %s318_s11 = sshll.u32 (!%p133_p2), %s313_s10, 1 }
   0x6   : > { %136 = sbr.rel (%p133_p2) target bundleno = 284 (0x11c), region = 28  ;;  %p168_p3 = scmp.lt.s32.totalorder (!%p133_p2), %s318_s11, 4 }
   0x7   : > { %p178_p4 = scmp.lt.s32.totalorder (!%p133_p2), %s318_s11, 5 }
   0xb   : > { %v353_v0 = vmov 0   ;;  %s169_s12 = scalar_select %p168_p3, %s318_s11, 4  ;;  %vm205_vm0 = vcmask 261120   ;;  %v193_v7 = vlaneseq  ;;  %vm242_vm4 = vcmask 7168  }
   0xc   : > { %335 = vset.pattern.permute.xlu1 %v353_v0  ;;  %336 = vset.pattern.permute.xlu0 %v353_v0  ;;  %s406_s11 = smov (!%p178_p4, %s318_s11), 5 }
   0xd   : > { %s319_s13 = sshll.u32 %s169_s12, 3  ;;  %s321_s17 = sshll.u32 %s406_s11, 3  ;;  %v194_v8 = vand.u32 127, %v193_v7 }
   0xe   : > { %s171_s16 = scalar_lea.vmem %s402_s0, %s319_s13  ;;  %s181_s20 = scalar_lea.vmem %s403_s1, %s321_s17 }
   0xf   : > { %v189_v1 = vld [vmem:[%s171_s16] sm:$0xff]  ;;  %v190_v4 = vld [vmem:[%s171_s16 + $0x8] sm:$0xff]  ;;  %s187_s23 = scalar_lea.vmem %s404_s2, %s321_s17 }
  0x10   : > { %v212_v2 = vsel %vm205_vm0, %v189_v1, -inf  ;;  %v191_v3 = vld [vmem:[%s181_s20] sm:$0xff]  ;;  %v215_v5 = vsel %vm205_vm0, %v190_v4, -inf  ;;  %v192_v6 = vld [vmem:[%s181_s20 + $0x8] sm:$0xff] }
  0x11   : > { %213 = vmax.xlane.f32.xlu0 %v212_v2  ;;  %196 = vperm.xlu1 %335, %v191_v3   ;;  %vm238_vm3 = vcmp.ge.s32.totalorder %v191_v3, 0  ;;  %vm239_vm5 = vcmp.ge.s32.totalorder %v192_v6, 0 }
  0x19   : > { %216 = vmax.xlane.f32.xlu0 %v215_v5  ;;  %199 = vperm.xlu1 %335, %v192_v6  }
  0x83   : > { %v197_v9 = vpop.permute.xlu1 %196 }
  0x84   : > { %v214_v10 = vpop.xlane.xlu0 %213  ;;  %vm201_vm1 = vcmp.eq.s32.totalorder %v194_v8, %v197_v9 }
  0x85   : > { %v218_v11 = vsub.f32 %v189_v1, %v214_v10  ;;  %v203_v12 = vsel %vm201_vm1, %v189_v1, -inf }
  0x86   : > { %v206_v13 = vsel %vm205_vm0, %v203_v12, -inf }
  0x87   : > { %v220_v14 = vmul.f32 1.442695, %v218_v11  ;;  %207 = vmax.xlane.f32.xlu0 %v206_v13 }
  0x89   : > { %337 = vpow2.f32 %v220_v14 }
  0x8b   : > { %v200_v15 = vpop.permute.xlu1 %199 }
  0x8c   : > { %v217_v16 = vpop.xlane.xlu0 %216  ;;  %vm202_vm2 = vcmp.eq.s32.totalorder %v194_v8, %v200_v15 }
  0x8d   : > { %v219_v17 = vsub.f32 %v190_v4, %v217_v16  ;;  %v204_v18 = vsel %vm202_vm2, %v190_v4, -inf }
  0x8e   : > { %v209_v19 = vsel %vm205_vm0, %v204_v18, -inf }
  0x8f   : > { %v338_v20 = vpop.eup %337  ;;  %v222_v21 = vmul.f32 1.442695, %v219_v17  ;;  %210 = vmax.xlane.f32.xlu1 %v209_v19 }
  0x90   : > { %v224_v22 = vsel %vm205_vm0, %v338_v20, 0.0 }
  0x91   : > { %339 = vpow2.f32 %v222_v21  ;;  %225 = vadd.xlane.f32.xlu2 %v224_v22 }
  0x97   : > { %v340_v23 = vpop.eup %339 }
  0x98   : > { %v227_v24 = vsel %vm205_vm0, %v340_v23, 0.0 }
  0x99   : > { %228 = vadd.xlane.f32.xlu2 %v227_v24 }
  0xfa   : > { %v208_v29 = vpop.xlane.xlu0 %207 }
 0x102   : > { %v211_v36 = vpop.xlane.xlu1 %210 }
 0x104   : > { %v226_v25 = vpop.xlane.xlu2 %225 }
 0x105   : > { %341 = vlog2.f32 %v226_v25 }
 0x10b   : > { %v342_v26 = vpop.eup %341 }
 0x10c   : > { %v231_v27 = vmul.f32 0.6931472, %v342_v26  ;;  %v229_v28 = vpop.xlane.xlu2 %228 }
 0x10d   : > { %343 = vlog2.f32 %v229_v28 }
 0x10e   : > { %v234_v30 = vadd.f32 %v231_v27, %v214_v10 }
 0x110   : > { %v236_v31 = vsub.f32 %v234_v30, %v208_v29 }
 0x112   : > { %v240_v32 = vsel %vm238_vm3, %v236_v31, 0.0 }
 0x113   : > { %v344_v33 = vpop.eup %343  ;;  %243 = vst.msk [vmem:[%s187_s23] sm:$0xff] %vm242_vm4, %v240_v32 }
 0x114   : > { %v233_v34 = vmul.f32 0.6931472, %v344_v33 }
 0x116   : > { %v235_v35 = vadd.f32 %v233_v34, %v217_v16 }
 0x118   : > { %v237_v37 = vsub.f32 %v235_v35, %v211_v36 }
 0x11a   : > { %v241_v38 = vsel %vm239_vm5, %v237_v37, 0.0 }
 0x11b   : > { %244 = vst.msk [vmem:[%s187_s23 + $0x8] sm:$0xff] %vm242_vm4, %v241_v38 }
 0x11c PF: > { %s12_s9 = sadd.s32 1, %s351_s9  }
 0x11d   : > { %p9_p5 = scmp.ge.s32.totalorder %s12_s9, 5  }
 0x11f   :  { %11 = sbr.rel (!%p9_p5) target bundleno = 1 (0x1), region = 61 }

</bundles_post_ra>
